<compile_context>
chip_gen: v6e
topology: v6e:2x2x1
jax: 0.10.0
libtpu: 0.0.40
codegen_flags: <defaults>
</compile_context>

<pallas_src>
import functools

import jax
import jax.numpy as jnp
from jax.experimental import pallas as pl
from jax.experimental.pallas import tpu as pltpu


def _round_up(x: int, m: int) -> int:
    return ((x + m - 1) // m) * m


def _num_tensorcores_per_chip() -> int:
    """Best-effort detection of multi-TensorCore chips (v7x). Defaults to 1."""
    try:
        kind = jax.devices()[0].device_kind.lower()
    except Exception:
        return 1
    return 2 if ("v7" in kind or "7x" in kind) else 1


def _triplet_kernel_small(p_ref, n_ref, o_ref, *, alpha, inv_b):
    """Whole problem in one block: compute the mean directly (f32 accumulate)."""
    p = p_ref[...].astype(jnp.float32)
    n = n_ref[...].astype(jnp.float32)
    hinge = jnp.maximum(p - n + alpha, 0.0)
    o_ref[...] = (jnp.sum(hinge, axis=0, keepdims=True) * inv_b).astype(o_ref.dtype)


def _triplet_kernel_tiled(p_ref, n_ref, o_ref, acc_ref, *, alpha, inv_b, batch,
                          need_row_mask):
    """Grid = (D tiles [parallel], batch tiles [arbitrary / reduction])."""
    b = pl.program_id(1)

    @pl.when(b == 0)
    def _():
        acc_ref[...] = jnp.zeros_like(acc_ref)

    p = p_ref[...].astype(jnp.float32)
    n = n_ref[...].astype(jnp.float32)
    hinge = jnp.maximum(p - n + alpha, 0.0)
    tb, td = hinge.shape

    if need_row_mask:
        # Last batch block hangs past B: zero those (garbage) rows.  Full blocks
        # satisfy rows < batch trivially, so the select is a no-op there.
        rows = b * tb + jax.lax.broadcasted_iota(jnp.int32, (tb, td), 0)
        hinge = jnp.where(rows < batch, hinge, 0.0)

    # Per-sublane partial sums: the reshape splits along the natural (8, 128)
    # sublane tiling (free view), so the per-step reduce stays on the VPU; the
    # single cross-sublane (XLU) reduce is deferred to the epilogue.
    acc_ref[...] += jnp.sum(hinge.reshape(tb // 8, 8, td), axis=0)

    @pl.when(b == pl.num_programs(1) - 1)
    def _():
        o_ref[...] = (jnp.sum(acc_ref[...], axis=0, keepdims=True) * inv_b).astype(
            o_ref.dtype
        )


def triplet_loss(p_dist: jax.Array, n_dist: jax.Array, alpha: float = 0.2, *,
                 block_bytes: int = 2 * 1024 * 1024,
                 small_path_max_bytes: int = 2 * 1024 * 1024) -> jax.Array:
    """Pallas TPU implementation of TripletLoss.forward((p_dist, n_dist))."""
    assert p_dist.shape == n_dist.shape and p_dist.ndim == 2
    assert p_dist.dtype == n_dist.dtype
    B, D = p_dist.shape
    alpha = float(alpha)
    inv_b = 1.0 / float(B)
    itemsize = jnp.dtype(p_dist.dtype).itemsize
    out_dtype = p_dist.dtype

    cost = pl.CostEstimate(
        flops=3 * B * D,
        transcendentals=0,
        bytes_accessed=2 * B * D * itemsize + D * itemsize,
    )

    # ---------- Small fast path: one block, no grid, no scratch. ----------
    if B * D * itemsize <= small_path_max_bytes:
        kernel = functools.partial(_triplet_kernel_small, alpha=alpha, inv_b=inv_b)
        out = pl.pallas_call(
            kernel,
            out_shape=jax.ShapeDtypeStruct((1, D), out_dtype),
            cost_estimate=cost,
        )(p_dist, n_dist)
        return out.reshape(D)

    # ---------- Tiled streaming-reduction path (no host padding). ----------
    num_tc = _num_tensorcores_per_chip()
    Dp = _round_up(D, 128)

    # Feature tile: prefer full row width (fully contiguous HBM reads) on
    # single-TC chips; for very wide rows use 512-wide (2 KiB) segments.
    td = Dp if Dp <= 1024 else 512
    # v7x (2 TCs): make sure the "parallel" D axis has extent >= 2 when possible
    # so both TensorCores stream; a no-op on v5e/v6e.
    if num_tc >= 2 and pl.cdiv(D, td) < 2 and Dp >= 256:
        td = _round_up(-(-Dp // 2), 128)
    n_d = pl.cdiv(D, td)

    # Batch tile sized so one input block is ~block_bytes (default 2 MiB).
    # With 2 inputs x 3 pipeline buffers that's ~12 MiB of input buffers plus
    # a few MiB of elementwise temporaries -- comfortably under the 32 MiB
    # vmem limit we request below on every generation.
    block_elems = max(td, block_bytes // itemsize)
    tb = max(8, (block_elems // td) // 8 * 8)
    tb = min(tb, _round_up(B, 8))
    n_b = pl.cdiv(B, tb)
    need_row_mask = (B % tb) != 0

    kernel = functools.partial(
        _triplet_kernel_tiled, alpha=alpha, inv_b=inv_b, batch=B,
        need_row_mask=need_row_mask,
    )

    def _in_map(d, b):
        return (b, d)

    # 3-deep input pipelining hides per-step DMA setup; fall back gracefully if
    # this jax version's BlockSpec does not take pipeline_mode.
    try:
        in_spec = pl.BlockSpec((tb, td), _in_map, pipeline_mode=pl.Buffered(3))
    except Exception:
        in_spec = pl.BlockSpec((tb, td), _in_map)

    out_width = n_d * td  # lane-dense, unmasked epilogue stores; sliced to D below

    out = pl.pallas_call(
        kernel,
        out_shape=jax.ShapeDtypeStruct((1, out_width), out_dtype),
        grid_spec=pltpu.PrefetchScalarGridSpec(
            num_scalar_prefetch=0,
            grid=(n_d, n_b),  # (D-parallel, batch-reduction last)
            in_specs=[in_spec, in_spec],
            out_specs=pl.BlockSpec((1, td), lambda d, b: (0, d)),
            scratch_shapes=[pltpu.VMEM((8, td), jnp.float32)],
        ),
        compiler_params=pltpu.CompilerParams(
            # D axis shards across TensorCores (v7x megacore); batch axis is the
            # reduction and stays sequential.
            dimension_semantics=("parallel", "arbitrary"),
            # Explicit limit: above v5e's 16 MiB scoped default, equal to v7x's
            # 32 MiB scoped default, well under every chip's physical VMEM.
            vmem_limit_bytes=32 * 1024 * 1024,
        ),
        cost_estimate=cost,
    )(p_dist, n_dist)
    return out[0, :D]


def triplet_loss_ref(p_dist, n_dist, alpha=0.2):
    return jnp.mean(jnp.maximum(p_dist - n_dist + alpha, 0.0), axis=0)


if __name__ == "__main__":
    key = jax.random.PRNGKey(0)
    k1, k2, k3, k4 = jax.random.split(key, 4)

    # Small shape -> single-block fast path.
    B, D = 16, 128
    p_small = jax.random.uniform(k1, (B, D), dtype=jnp.float32)
    n_small = jax.random.uniform(k2, (B, D), dtype=jnp.float32)
    out_small = jax.block_until_ready(triplet_loss(p_small, n_small, alpha=0.2))
    ref_small = triplet_loss_ref(p_small, n_small, alpha=0.2)
    assert out_small.shape == (D,)
    assert jnp.allclose(out_small, ref_small, atol=1e-5, rtol=1e-4), "small path mismatch"

    # Modest ragged shape (B not mult of 8, D not mult of 128), forced through
    # the tiled streaming path with tiny blocks so multi-step accumulation, the
    # in-kernel row mask, and the D-overhang handling are all exercised.
    B2, D2 = 530, 200
    p_big = jax.random.uniform(k3, (B2, D2), dtype=jnp.float32)
    n_big = jax.random.uniform(k4, (B2, D2), dtype=jnp.float32)
    out_big = jax.block_until_ready(
        triplet_loss(p_big, n_big, alpha=0.2,
                     block_bytes=64 * 1024, small_path_max_bytes=0)
    )
    ref_big = triplet_loss_ref(p_big, n_big, alpha=0.2)
    assert out_big.shape == (D2,)
    assert jnp.allclose(out_big, ref_big, atol=1e-5, rtol=1e-4), "tiled path mismatch"

    print("KERNEL_OK")
</pallas_src>

<mosaic_0001>
module attributes {stable_mosaic.version = 11 : i64} {
  func.func @_triplet_kernel_small(%arg0: memref<16x128xf32, #tpu.memory_space<vmem>>, %arg1: memref<16x128xf32, #tpu.memory_space<vmem>>, %arg2: memref<1x128xf32, #tpu.memory_space<vmem>>) attributes {dimension_semantics = [], scalar_prefetch = 0 : i64, scratch_operands = 0 : i64, tpu.core_type = #tpu.core_type<tc>} {
    %c0 = arith.constant 0 : index
    %c0_0 = arith.constant 0 : index
    %0 = vector.load %arg0[%c0, %c0_0] : memref<16x128xf32, #tpu.memory_space<vmem>>, vector<16x128xf32>
    %c0_1 = arith.constant 0 : index
    %c0_2 = arith.constant 0 : index
    %1 = vector.load %arg1[%c0_1, %c0_2] : memref<16x128xf32, #tpu.memory_space<vmem>>, vector<16x128xf32>
    %2 = arith.subf %0, %1 : vector<16x128xf32>
    %cst = arith.constant 2.000000e-01 : f32
    %3 = vector.broadcast %cst : f32 to vector<16x128xf32>
    %4 = arith.addf %2, %3 : vector<16x128xf32>
    %cst_3 = arith.constant 0.000000e+00 : f32
    %5 = vector.broadcast %cst_3 : f32 to vector<16x128xf32>
    %6 = arith.maximumf %4, %5 : vector<16x128xf32>
    %cst_4 = arith.constant dense<0.000000e+00> : vector<128xf32>
    %7 = vector.multi_reduction <add>, %6, %cst_4 [0] : vector<16x128xf32> to vector<128xf32>
    %8 = vector.shape_cast %7 : vector<128xf32> to vector<1x128xf32>
    %cst_5 = arith.constant 6.250000e-02 : f32
    %9 = vector.broadcast %cst_5 : f32 to vector<1x128xf32>
    %10 = arith.mulf %8, %9 : vector<1x128xf32>
    %c0_6 = arith.constant 0 : index
    %c0_7 = arith.constant 0 : index
    %11 = vector.load %arg2[%c0_6, %c0_7] : memref<1x128xf32, #tpu.memory_space<vmem>>, vector<1x128xf32>
    tpu.vector_store %arg2[%c0_6, %c0_7], %10 {strides = array<i32>} : memref<1x128xf32, #tpu.memory_space<vmem>>, vector<1x128xf32>,
    return
  }
}

</mosaic_0001>

<bundles_post_ra>
// kernel: tpu_custom_call.1
= control target key start
LH: loop header
LB: loop body
LE: loop exit
PB: predicated region body
PF: predicated region fallthrough
CT: control target
= control target key end

     0   :  { %7 = vsyncpa [#allocation3], 0  ;;  %s175_s0 = inlined_call_operand.hbm [shape: f32[16,128], index: 0, kind: input, shape index: {}]   ;;  %s176_s1 = inlined_call_operand.hbm [shape: f32[16,128], index: 1, kind: input, shape index: {}]   ;;  %s177_s2 = inlined_call_operand.hbm [shape: f32[1,128], index: 2, kind: output, shape index: {}]  }
   0x1   :  { %8 = vsyncpa [#allocation6], 0 }
   0x2   :  { %9 = vsyncpa [#allocation4], 0  ;;  %s146_s9 = smov [#allocation2]  }
   0x3   :  { %s15_s10 = sshll.u32 %s146_s9, 4  ;;  %s16_s10 = int_to_ptr.vmem [resolvable:$true] %s15_s10 }
   0x4   :  { %s88_s11 = scalar_lea.vmem %s16_s10, 256  ;;  %p93_p1 = scmp.lt.s32.totalorder %s16_s10, %s16_s10 }
   0x5   :  { %p89_p0 = scmp.ne.s32.totalorder %s16_s10, %s88_s11  ;;  %p94_p2 = scmp.lt.s32.totalorder %s88_s11, %s88_s11 }
   0x7   :  { %p95_p3 = por %p94_p2, %p93_p1 }
   0x9   :  { %p96_p4 = pnand %p95_p3, %p89_p0 }
   0xb   :  { %99 = shalt.err (!%p96_p4)
}
   0xc   :  { %s147_s12 = smov 128   ;;  %s148_s13 = smov 8  }
   0xd   :  { %21 = dma.hbm_to_vmem [thread:$0]  %s175_s0, 256, %s16_s10, [#allocation3], %s147_s12, %s147_s12, %s148_s13  }
   0xe   :  { %s149_s16 = smov [#allocation5]  }
   0xf   :  { %s27_s17 = sshll.u32 %s149_s16, 4  ;;  %s28_s17 = int_to_ptr.vmem [resolvable:$true] %s27_s17 }
  0x10   :  { %s108_s18 = scalar_lea.vmem %s28_s17, 256  ;;  %p113_p6 = scmp.lt.s32.totalorder %s28_s17, %s28_s17 }
  0x11   :  { %p109_p5 = scmp.ne.s32.totalorder %s28_s17, %s108_s18  ;;  %p114_p7 = scmp.lt.s32.totalorder %s108_s18, %s108_s18 }
  0x13   :  { %p115_p8 = por %p114_p7, %p113_p6 }
  0x15   :  { %p116_p9 = pnand %p115_p8, %p109_p5 }
  0x17   :  { %119 = shalt.err (!%p116_p9)
}
  0x18   :  { %33 = dma.hbm_to_vmem [thread:$0]  %s176_s1, 256, %s28_s17, [#allocation6], %s147_s12, %s147_s12, %s148_s13  }
  0x19   :  { %140 = dma.done.wait [#allocation3], 256  }
  0x1a   :  { %141 = vsyncadd [#allocation3], 4294967040 }
  0x1b   :  { %142 = dma.done.wait [#allocation6], 256  }
  0x1c   :  { %143 = vsyncadd [#allocation6], 4294967040  ;;  %v40_v0 = vld [vmem:[#allocation2] sm:$0xff]  ;;  %v41_v1 = vld [vmem:[#allocation2 + $0x8] sm:$0xff]  ;;  %s150_s0 = smov [#allocation7]  }
  0x1d   :  { %v42_v2 = vld [vmem:[#allocation5] sm:$0xff]  ;;  %v43_v3 = vld [vmem:[#allocation5 + $0x8] sm:$0xff]  ;;  %s65_s1 = sshll.u32 %s150_s0, 4  ;;  %s66_s1 = int_to_ptr.vmem [resolvable:$true] %s65_s1 }
  0x1e   :  { %v44_v4 = vsub.f32 %v40_v0, %v42_v2  ;;  %v45_v5 = vsub.f32 %v41_v1, %v43_v3  ;;  %s120_s21 = scalar_lea.vmem %s66_s1, 16  ;;  %s124_s22 = scalar_lea.vmem %s66_s1, 32 }
  0x1f   :  { %p121_p10 = scmp.ne.s32.totalorder %s66_s1, %s120_s21  ;;  %p125_p11 = scmp.lt.s32.totalorder %s66_s1, %s66_s1 }
  0x20   :  { %v46_v6 = vadd.f32 0.2, %v44_v4  ;;  %v47_v7 = vadd.f32 0.2, %v45_v5  ;;  %p126_p12 = scmp.lt.s32.totalorder %s124_s22, %s120_s21 }
  0x22   :  { %v48_v8 = vmax.f32 %v46_v6, 0.0  ;;  %v49_v9 = vmax.f32 %v47_v7, 0.0  ;;  %p127_p13 = por %p126_p12, %p125_p11 }
  0x24   :  { %v50_v10 = vadd.f32 %v49_v9, %v48_v8  ;;  %p128_p0 = pnand %p127_p13, %p121_p10 }
  0x26   :  { %v51_v11 = vrot.slane %v50_v10, 4 }
  0x28   :  { %v52_v12 = vadd.f32 %v51_v11, %v50_v10 }
  0x2a   :  { %v53_v13 = vrot.slane %v52_v12, 2 }
  0x2c   :  { %v54_v14 = vadd.f32 %v53_v13, %v52_v12 }
  0x2e   :  { %v55_v15 = vrot.slane %v54_v14, 1 }
  0x30   :  { %v56_v16 = vadd.f32 %v55_v15, %v54_v14 }
  0x32   :  { %v57_v17 = vmul.f32 0.0625, %v56_v16 }
  0x34   :  { %58 = vst [vmem:[#allocation7] sm:$0x1] %v57_v17 }
  0x35   :  { %131 = shalt.err (!%p128_p0)
}
  0x36   :  { %68 = dma.vmem_to_hbm [thread:$0]  %s66_s1, 16, %s177_s2, [#allocation4]  }
  0x37   :  { %144 = dma.done.wait [#allocation4], 16  }
  0x38   :  { %145 = vsyncadd [#allocation4], 4294967280 }
  0x39   :  { %72 = vsyncpa [#allocation3], 1 }
  0x3a   :  { %73 = vsyncpa [#allocation6], 1 }
  0x3b   :  { %74 = vsyncpa [#allocation4], 1 }

</bundles_post_ra>
